<compile_context>
chip_gen: v7x
topology: tpu7x:2x2x1
jax: 0.10.0
libtpu: 0.0.40
codegen_flags: <defaults>
</compile_context>

<pallas_src>
import functools

import jax
import jax.numpy as jnp
from jax import lax
from jax.experimental import pallas as pl
from jax.experimental.pallas import tpu as pltpu

EPS = 1e-8          # Dice / BatchNorm1d epsilon
LANE = 128
DEFAULT_TILE_N = 512


def _round_up(x, m):
    return (x + m - 1) // m * m


def _pad2d(a, rows, cols):
    return jnp.pad(a, ((0, rows - a.shape[0]), (0, cols - a.shape[1])))


def _lau_dice_kernel(n_valid, tile_n,
                     qb_ref, ub_ref, w1q_ref, w1u_ref, w1p_ref, b1_ref,
                     gamma_ref, beta_ref, alpha_ref, w2_ref, b2_ref,
                     w3_ref, b3_ref,
                     o_ref,
                     sum_ref, sq_ref, scale_ref, shift_ref):
    phase = pl.program_id(0)
    j = pl.program_id(1)

    # fc1 layer 0 (Linear 4E->H1) with the concat folded into three weights.
    q = qb_ref[...]
    u = ub_ref[...]
    h1 = (jnp.dot(q, w1q_ref[...], preferred_element_type=jnp.float32)
          + jnp.dot(u, w1u_ref[...], preferred_element_type=jnp.float32)
          + jnp.dot(q * u, w1p_ref[...], preferred_element_type=jnp.float32)
          + b1_ref[...])

    @pl.when(jnp.logical_and(phase == 0, j == 0))
    def _():
        sum_ref[...] = jnp.zeros_like(sum_ref)
        sq_ref[...] = jnp.zeros_like(sq_ref)

    @pl.when(phase == 0)
    def _():
        # One-pass BN statistics; mask padded rows of the last tile.
        row = lax.broadcasted_iota(jnp.int32, (tile_n, 1), 0) + j * tile_n
        h1m = jnp.where(row < n_valid, h1, 0.0)
        sum_ref[...] = sum_ref[...] + jnp.sum(h1m, axis=0, keepdims=True)
        sq_ref[...] = sq_ref[...] + jnp.sum(h1m * h1m, axis=0, keepdims=True)

    @pl.when(jnp.logical_and(phase == 1, j == 0))
    def _():
        inv_n = jnp.float32(1.0 / n_valid)
        mean = sum_ref[...] * inv_n
        var = jnp.maximum(sq_ref[...] * inv_n - mean * mean, 0.0)  # biased var
        scale = gamma_ref[...] * lax.rsqrt(var + EPS)
        scale_ref[...] = scale
        shift_ref[...] = beta_ref[...] - mean * scale

    @pl.when(phase == 1)
    def _():
        # Dice: sigmoid(BN(h1)) gate, d = h1 * (alpha + (1-alpha)*p).
        xn = h1 * scale_ref[...] + shift_ref[...]
        x_p = 1.0 / (1.0 + jnp.exp(-xn))            # exp on the EUP slot
        a = alpha_ref[...]
        d = h1 * (a + (1.0 - a) * x_p)

        # fc1 layer 1 (Linear H1->H2), no activation.
        h2 = (jnp.dot(d, w2_ref[...], preferred_element_type=jnp.float32)
              + b2_ref[...])

        # fc2 (Linear H2->1) as a lane-dense [1, tile_n] contraction so the
        # output store is a full 128-wide row instead of a masked [*, 1] column.
        score = lax.dot_general(
            w3_ref[...], h2,
            dimension_numbers=(((1,), (1,)), ((), ())),
            preferred_element_type=jnp.float32)
        o_ref[...] = score + b3_ref[...]


def local_activation_unit(query, user_behavior, params, *, tile_n=DEFAULT_TILE_N):
    """query: [B, 1, E], user_behavior: [B, T, E] -> attention_score: [B, T, 1]."""
    B, T, E = user_behavior.shape
    N = B * T
    H1 = params["w1"].shape[1]
    H2 = params["w2"].shape[1]
    H1p = _round_up(H1, LANE)
    H2p = _round_up(H2, LANE)

    f32 = jnp.float32
    tile_n = min(tile_n, _round_up(N, LANE))
    n_pad = _round_up(N, tile_n)
    num_tiles = n_pad // tile_n

    # Row-major [N, E] views of the two feature streams; the 4E concat is never
    # materialized (folded into the weights below).
    qb = jnp.broadcast_to(query, (B, T, E)).reshape(N, E).astype(f32)
    ub = user_behavior.reshape(N, E).astype(f32)
    qb = jnp.pad(qb, ((0, n_pad - N), (0, 0)))
    ub = jnp.pad(ub, ((0, n_pad - N), (0, 0)))

    # Fold cat([q, u, q-u, q*u]) @ W1 and zero-pad channels to 128 lanes.
    w1 = params["w1"].astype(f32)
    w1q = _pad2d(w1[:E] + w1[2 * E:3 * E], E, H1p)
    w1u = _pad2d(w1[E:2 * E] - w1[2 * E:3 * E], E, H1p)
    w1p = _pad2d(w1[3 * E:4 * E], E, H1p)
    b1 = _pad2d(params["b1"].astype(f32), 1, H1p)
    gamma = _pad2d(params["gamma"].astype(f32), 1, H1p)
    beta = _pad2d(params["beta"].astype(f32), 1, H1p)
    alpha = _pad2d(params["alpha"].astype(f32), 1, H1p)
    w2 = _pad2d(params["w2"].astype(f32), H1p, H2p)
    b2 = _pad2d(params["b2"].astype(f32), 1, H2p)
    w3 = _pad2d(params["w3"].astype(f32).T, 1, H2p)      # [1, H2p] row vector
    b3 = params["b3"].astype(f32).reshape(1, 1)

    row_spec = pl.BlockSpec((tile_n, E), lambda p, j: (j, 0))

    def _const_spec(a):
        nd = a.ndim
        return pl.BlockSpec(a.shape, lambda p, j, nd=nd: (0,) * nd)

    args = (qb, ub, w1q, w1u, w1p, b1, gamma, beta, alpha, w2, b2, w3, b3)
    in_specs = [row_spec, row_spec] + [_const_spec(a) for a in args[2:]]
    # Output block stays parked at (0, 0) during the stats phase (never written)
    # and walks the tiles lane-densely during phase 1.
    out_spec = pl.BlockSpec((1, tile_n), lambda p, j: (0, j * p))

    kernel = functools.partial(_lau_dice_kernel, N, tile_n)

    cost = pl.CostEstimate(
        flops=2 * n_pad * (2 * 3 * E * H1p + H1p * H2p + H2p),
        transcendentals=n_pad * H1p,
        bytes_accessed=4 * (2 * 2 * n_pad * E + n_pad
                            + 3 * E * H1p + 4 * H1p + H1p * H2p + 2 * H2p + 2),
    )

    out = pl.pallas_call(
        kernel,
        out_shape=jax.ShapeDtypeStruct((1, n_pad), f32),
        grid_spec=pltpu.PrefetchScalarGridSpec(
            num_scalar_prefetch=0,
            grid=(2, num_tiles),                 # (phase, N-tiles)
            in_specs=in_specs,
            out_specs=out_spec,
            scratch_shapes=[pltpu.VMEM((1, H1p), f32)] * 4,  # sum, sumsq, scale, shift
        ),
        compiler_params=pltpu.CompilerParams(
            dimension_semantics=("arbitrary", "arbitrary"),  # sequential: stats carry
            vmem_limit_bytes=32 * 1024 * 1024),
        cost_estimate=cost,
    )(*args)

    return out.reshape(-1)[:N].reshape(B, T, 1)


def reference(query, user_behavior, params):
    """Pure-JAX reference replicating the PyTorch forward (training-mode BN)."""
    B, T, E = user_behavior.shape
    queries = jnp.broadcast_to(query, (B, T, E))
    x = jnp.concatenate(
        [queries, user_behavior, queries - user_behavior, queries * user_behavior],
        axis=-1).reshape(B * T, 4 * E)
    h1 = jnp.dot(x, params["w1"], preferred_element_type=jnp.float32) + params["b1"]
    mean = h1.mean(axis=0, keepdims=True)
    var = ((h1 - mean) ** 2).mean(axis=0, keepdims=True)
    xn = (h1 - mean) / jnp.sqrt(var + EPS) * params["gamma"] + params["beta"]
    x_p = jax.nn.sigmoid(xn)
    d = params["alpha"] * (1.0 - x_p) * h1 + x_p * h1
    h2 = jnp.dot(d, params["w2"], preferred_element_type=jnp.float32) + params["b2"]
    out = jnp.dot(h2, params["w3"], preferred_element_type=jnp.float32) + params["b3"]
    return out.reshape(B, T, 1)


if __name__ == "__main__":
    key = jax.random.PRNGKey(0)
    B, T, E = 2, 8, 4           # embedding_dim=4 (module default)
    H1, H2 = 80, 40             # hidden_unit=[80, 40]
    ks = jax.random.split(key, 6)

    query = jax.random.normal(ks[0], (B, 1, E), jnp.float32)
    user_behavior = jax.random.normal(ks[1], (B, T, E), jnp.float32)

    def xavier_normal(k, fan_in, fan_out):
        std = (2.0 / (fan_in + fan_out)) ** 0.5
        return std * jax.random.normal(k, (fan_in, fan_out), jnp.float32)

    params = dict(
        # fc1 layer 0: Linear(4E, 80), xavier_normal weight, zero bias
        w1=xavier_normal(ks[2], 4 * E, H1),
        b1=jnp.zeros((1, H1), jnp.float32),
        # Dice(80, dim=3): BN gamma=1, beta=0, alpha=0 (PyTorch init)
        gamma=jnp.ones((1, H1), jnp.float32),
        beta=jnp.zeros((1, H1), jnp.float32),
        alpha=jnp.zeros((1, H1), jnp.float32),
        # fc1 layer 1: Linear(80, 40), xavier_normal weight, zero bias
        w2=xavier_normal(ks[3], H1, H2),
        b2=jnp.zeros((1, H2), jnp.float32),
        # fc2: Linear(40, 1) — deterministic synthetic init
        w3=xavier_normal(ks[4], H2, 1),
        b3=0.1 * jax.random.normal(ks[5], (1, 1), jnp.float32),
    )

    out = jax.block_until_ready(local_activation_unit(query, user_behavior, params))
    ref = reference(query, user_behavior, params)

    assert out.shape == (B, T, 1), out.shape
    assert jnp.allclose(out, ref, atol=2e-3, rtol=2e-3), (
        "mismatch", float(jnp.max(jnp.abs(out - ref))))
    print("KERNEL_OK")
</pallas_src>

<mosaic_0001>
module attributes {stable_mosaic.version = 11 : i64} {
  func.func @_lau_dice_kernel(%arg0: i32, %arg1: i32, %arg2: memref<128x4xf32, #tpu.memory_space<vmem>>, %arg3: memref<128x4xf32, #tpu.memory_space<vmem>>, %arg4: memref<4x128xf32, #tpu.memory_space<vmem>>, %arg5: memref<4x128xf32, #tpu.memory_space<vmem>>, %arg6: memref<4x128xf32, #tpu.memory_space<vmem>>, %arg7: memref<1x128xf32, #tpu.memory_space<vmem>>, %arg8: memref<1x128xf32, #tpu.memory_space<vmem>>, %arg9: memref<1x128xf32, #tpu.memory_space<vmem>>, %arg10: memref<1x128xf32, #tpu.memory_space<vmem>>, %arg11: memref<128x128xf32, #tpu.memory_space<vmem>>, %arg12: memref<1x128xf32, #tpu.memory_space<vmem>>, %arg13: memref<1x128xf32, #tpu.memory_space<vmem>>, %arg14: memref<1x1xf32, #tpu.memory_space<vmem>>, %arg15: memref<1x128xf32, #tpu.memory_space<vmem>>, %arg16: memref<1x128xf32, #tpu.memory_space<vmem>>, %arg17: memref<1x128xf32, #tpu.memory_space<vmem>>, %arg18: memref<1x128xf32, #tpu.memory_space<vmem>>, %arg19: memref<1x128xf32, #tpu.memory_space<vmem>>) attributes {dimension_semantics = [#tpu.dimension_semantics<arbitrary>, #tpu.dimension_semantics<arbitrary>], iteration_bounds = array<i64: 2, 1>, scalar_prefetch = 0 : i64, scratch_operands = 4 : i64, tpu.core_type = #tpu.core_type<tc>, window_params = [{transform_indices = @transform_0, window_bounds = array<i64: 128, 4>}, {transform_indices = @transform_1, window_bounds = array<i64: 128, 4>}, {pipeline_mode = #tpu.pipeline_mode<synchronous>, transform_indices = @transform_2, window_bounds = array<i64: 4, 128>}, {pipeline_mode = #tpu.pipeline_mode<synchronous>, transform_indices = @transform_3, window_bounds = array<i64: 4, 128>}, {pipeline_mode = #tpu.pipeline_mode<synchronous>, transform_indices = @transform_4, window_bounds = array<i64: 4, 128>}, {pipeline_mode = #tpu.pipeline_mode<synchronous>, transform_indices = @transform_5, window_bounds = array<i64: 1, 128>}, {pipeline_mode = #tpu.pipeline_mode<synchronous>, transform_indices = @transform_6, window_bounds = array<i64: 1, 128>}, {pipeline_mode = #tpu.pipeline_mode<synchronous>, transform_indices = @transform_7, window_bounds = array<i64: 1, 128>}, {pipeline_mode = #tpu.pipeline_mode<synchronous>, transform_indices = @transform_8, window_bounds = array<i64: 1, 128>}, {pipeline_mode = #tpu.pipeline_mode<synchronous>, transform_indices = @transform_9, window_bounds = array<i64: 128, 128>}, {pipeline_mode = #tpu.pipeline_mode<synchronous>, transform_indices = @transform_10, window_bounds = array<i64: 1, 128>}, {pipeline_mode = #tpu.pipeline_mode<synchronous>, transform_indices = @transform_11, window_bounds = array<i64: 1, 128>}, {pipeline_mode = #tpu.pipeline_mode<synchronous>, transform_indices = @transform_12, window_bounds = array<i64: 1, 1>}, {transform_indices = @transform_13, window_bounds = array<i64: 1, 128>}]} {
    %c0 = arith.constant 0 : index
    %c0_0 = arith.constant 0 : index
    %0 = vector.load %arg2[%c0, %c0_0] : memref<128x4xf32, #tpu.memory_space<vmem>>, vector<128x4xf32>
    %c0_1 = arith.constant 0 : index
    %c0_2 = arith.constant 0 : index
    %1 = vector.load %arg3[%c0_1, %c0_2] : memref<128x4xf32, #tpu.memory_space<vmem>>, vector<128x4xf32>
    %c0_3 = arith.constant 0 : index
    %c0_4 = arith.constant 0 : index
    %2 = vector.load %arg4[%c0_3, %c0_4] : memref<4x128xf32, #tpu.memory_space<vmem>>, vector<4x128xf32>
    %cst = arith.constant dense<0.000000e+00> : vector<128x128xf32>
    %3 = tpu.matmul %0, %2, %cst {dimension_numbers = #tpu.dot_dimension_numbers<[1], [0], [0], [1], [0, 0, 1, 1], [], []>} : vector<128x4xf32>, vector<4x128xf32>, vector<128x128xf32> -> vector<128x128xf32>
    %c0_5 = arith.constant 0 : index
    %c0_6 = arith.constant 0 : index
    %4 = vector.load %arg5[%c0_5, %c0_6] : memref<4x128xf32, #tpu.memory_space<vmem>>, vector<4x128xf32>
    %cst_7 = arith.constant dense<0.000000e+00> : vector<128x128xf32>
    %5 = tpu.matmul %1, %4, %cst_7 {dimension_numbers = #tpu.dot_dimension_numbers<[1], [0], [0], [1], [0, 0, 1, 1], [], []>} : vector<128x4xf32>, vector<4x128xf32>, vector<128x128xf32> -> vector<128x128xf32>
    %6 = arith.addf %3, %5 : vector<128x128xf32>
    %7 = arith.mulf %0, %1 : vector<128x4xf32>
    %c0_8 = arith.constant 0 : index
    %c0_9 = arith.constant 0 : index
    %8 = vector.load %arg6[%c0_8, %c0_9] : memref<4x128xf32, #tpu.memory_space<vmem>>, vector<4x128xf32>
    %cst_10 = arith.constant dense<0.000000e+00> : vector<128x128xf32>
    %9 = tpu.matmul %7, %8, %cst_10 {dimension_numbers = #tpu.dot_dimension_numbers<[1], [0], [0], [1], [0, 0, 1, 1], [], []>} : vector<128x4xf32>, vector<4x128xf32>, vector<128x128xf32> -> vector<128x128xf32>
    %10 = arith.addf %6, %9 : vector<128x128xf32>
    %c0_11 = arith.constant 0 : index
    %c0_12 = arith.constant 0 : index
    %11 = vector.load %arg7[%c0_11, %c0_12] : memref<1x128xf32, #tpu.memory_space<vmem>>, vector<1x128xf32>
    %12 = vector.broadcast %11 : vector<1x128xf32> to vector<128x128xf32>
    %13 = arith.addf %10, %12 : vector<128x128xf32>
    %c0_i32 = arith.constant 0 : i32
    %14 = arith.cmpi eq, %arg0, %c0_i32 : i32
    %c0_i32_13 = arith.constant 0 : i32
    %15 = arith.cmpi eq, %arg1, %c0_i32_13 : i32
    %16 = arith.andi %14, %15 : i1
    %17 = arith.extui %16 : i1 to i32
    %c0_i32_14 = arith.constant 0 : i32
    %18 = arith.cmpi ne, %17, %c0_i32_14 : i32
    scf.if %18 {
      %cst_21 = arith.constant 0.000000e+00 : f32
      %30 = vector.broadcast %cst_21 : f32 to vector<1x128xf32>
      %c0_22 = arith.constant 0 : index
      %c0_23 = arith.constant 0 : index
      %31 = vector.load %arg16[%c0_22, %c0_23] : memref<1x128xf32, #tpu.memory_space<vmem>>, vector<1x128xf32>
      tpu.vector_store %arg16[%c0_22, %c0_23], %30 {strides = array<i32>} : memref<1x128xf32, #tpu.memory_space<vmem>>, vector<1x128xf32>,
      %cst_24 = arith.constant 0.000000e+00 : f32
      %32 = vector.broadcast %cst_24 : f32 to vector<1x128xf32>
      %c0_25 = arith.constant 0 : index
      %c0_26 = arith.constant 0 : index
      %33 = vector.load %arg17[%c0_25, %c0_26] : memref<1x128xf32, #tpu.memory_space<vmem>>, vector<1x128xf32>
      tpu.vector_store %arg17[%c0_25, %c0_26], %32 {strides = array<i32>} : memref<1x128xf32, #tpu.memory_space<vmem>>, vector<1x128xf32>,
    } else {
    }
    %c0_i32_15 = arith.constant 0 : i32
    %19 = arith.cmpi eq, %arg0, %c0_i32_15 : i32
    %20 = arith.extui %19 : i1 to i32
    %c0_i32_16 = arith.constant 0 : i32
    %21 = arith.cmpi ne, %20, %c0_i32_16 : i32
    scf.if %21 {
      %30 = tpu.iota {dimensions = array<i32: 0>} : vector<128x1xi32>
      %c128_i32 = arith.constant 128 : i32
      %31 = arith.muli %arg1, %c128_i32 : i32
      %32 = vector.broadcast %31 : i32 to vector<128x1xi32>
      %33 = arith.addi %30, %32 : vector<128x1xi32>
      %c16_i32 = arith.constant 16 : i32
      %34 = vector.broadcast %c16_i32 : i32 to vector<128x1xi32>
      %35 = arith.cmpi slt, %33, %34 : vector<128x1xi32>
      %cst_21 = arith.constant 0.000000e+00 : f32
      %36 = vector.shape_cast %35 : vector<128x1xi1> to vector<128x1xi1>
      %37 = vector.broadcast %36 : vector<128x1xi1> to vector<128x128xi1>
      %38 = vector.broadcast %cst_21 : f32 to vector<128x128xf32>
      %39 = arith.select %37, %13, %38 : vector<128x128xi1>, vector<128x128xf32>
      %c0_22 = arith.constant 0 : index
      %c0_23 = arith.constant 0 : index
      %40 = vector.load %arg16[%c0_22, %c0_23] : memref<1x128xf32, #tpu.memory_space<vmem>>, vector<1x128xf32>
      %cst_24 = arith.constant dense<0.000000e+00> : vector<128xf32>
      %41 = vector.multi_reduction <add>, %39, %cst_24 [0] : vector<128x128xf32> to vector<128xf32>
      %42 = vector.shape_cast %41 : vector<128xf32> to vector<1x128xf32>
      %43 = arith.addf %40, %42 : vector<1x128xf32>
      %c0_25 = arith.constant 0 : index
      %c0_26 = arith.constant 0 : index
      %44 = vector.load %arg16[%c0_25, %c0_26] : memref<1x128xf32, #tpu.memory_space<vmem>>, vector<1x128xf32>
      tpu.vector_store %arg16[%c0_25, %c0_26], %43 {strides = array<i32>} : memref<1x128xf32, #tpu.memory_space<vmem>>, vector<1x128xf32>,
      %c0_27 = arith.constant 0 : index
      %c0_28 = arith.constant 0 : index
      %45 = vector.load %arg17[%c0_27, %c0_28] : memref<1x128xf32, #tpu.memory_space<vmem>>, vector<1x128xf32>
      %46 = arith.mulf %39, %39 : vector<128x128xf32>
      %cst_29 = arith.constant dense<0.000000e+00> : vector<128xf32>
      %47 = vector.multi_reduction <add>, %46, %cst_29 [0] : vector<128x128xf32> to vector<128xf32>
      %48 = vector.shape_cast %47 : vector<128xf32> to vector<1x128xf32>
      %49 = arith.addf %45, %48 : vector<1x128xf32>
      %c0_30 = arith.constant 0 : index
      %c0_31 = arith.constant 0 : index
      %50 = vector.load %arg17[%c0_30, %c0_31] : memref<1x128xf32, #tpu.memory_space<vmem>>, vector<1x128xf32>
      tpu.vector_store %arg17[%c0_30, %c0_31], %49 {strides = array<i32>} : memref<1x128xf32, #tpu.memory_space<vmem>>, vector<1x128xf32>,
    } else {
    }
    %c1_i32 = arith.constant 1 : i32
    %22 = arith.cmpi eq, %arg0, %c1_i32 : i32
    %c0_i32_17 = arith.constant 0 : i32
    %23 = arith.cmpi eq, %arg1, %c0_i32_17 : i32
    %24 = arith.andi %22, %23 : i1
    %25 = arith.extui %24 : i1 to i32
    %c0_i32_18 = arith.constant 0 : i32
    %26 = arith.cmpi ne, %25, %c0_i32_18 : i32
    scf.if %26 {
      %c0_21 = arith.constant 0 : index
      %c0_22 = arith.constant 0 : index
      %30 = vector.load %arg16[%c0_21, %c0_22] : memref<1x128xf32, #tpu.memory_space<vmem>>, vector<1x128xf32>
      %cst_23 = arith.constant 6.250000e-02 : f32
      %31 = vector.broadcast %cst_23 : f32 to vector<1x128xf32>
      %32 = arith.mulf %30, %31 : vector<1x128xf32>
      %c0_24 = arith.constant 0 : index
      %c0_25 = arith.constant 0 : index
      %33 = vector.load %arg17[%c0_24, %c0_25] : memref<1x128xf32, #tpu.memory_space<vmem>>, vector<1x128xf32>
      %cst_26 = arith.constant 6.250000e-02 : f32
      %34 = vector.broadcast %cst_26 : f32 to vector<1x128xf32>
      %35 = arith.mulf %33, %34 : vector<1x128xf32>
      %36 = arith.mulf %32, %32 : vector<1x128xf32>
      %37 = arith.subf %35, %36 : vector<1x128xf32>
      %cst_27 = arith.constant 0.000000e+00 : f32
      %38 = vector.broadcast %cst_27 : f32 to vector<1x128xf32>
      %39 = arith.maximumf %37, %38 : vector<1x128xf32>
      %c0_28 = arith.constant 0 : index
      %c0_29 = arith.constant 0 : index
      %40 = vector.load %arg8[%c0_28, %c0_29] : memref<1x128xf32, #tpu.memory_space<vmem>>, vector<1x128xf32>
      %cst_30 = arith.constant 9.99999993E-9 : f32
      %41 = vector.broadcast %cst_30 : f32 to vector<1x128xf32>
      %42 = arith.addf %39, %41 : vector<1x128xf32>
      %43 = math.rsqrt %42 : vector<1x128xf32>
      %44 = arith.mulf %40, %43 : vector<1x128xf32>
      %c0_31 = arith.constant 0 : index
      %c0_32 = arith.constant 0 : index
      %45 = vector.load %arg18[%c0_31, %c0_32] : memref<1x128xf32, #tpu.memory_space<vmem>>, vector<1x128xf32>
      tpu.vector_store %arg18[%c0_31, %c0_32], %44 {strides = array<i32>} : memref<1x128xf32, #tpu.memory_space<vmem>>, vector<1x128xf32>,
      %c0_33 = arith.constant 0 : index
      %c0_34 = arith.constant 0 : index
      %46 = vector.load %arg9[%c0_33, %c0_34] : memref<1x128xf32, #tpu.memory_space<vmem>>, vector<1x128xf32>
      %47 = arith.mulf %32, %44 : vector<1x128xf32>
      %48 = arith.subf %46, %47 : vector<1x128xf32>
      %c0_35 = arith.constant 0 : index
      %c0_36 = arith.constant 0 : index
      %49 = vector.load %arg19[%c0_35, %c0_36] : memref<1x128xf32, #tpu.memory_space<vmem>>, vector<1x128xf32>
      tpu.vector_store %arg19[%c0_35, %c0_36], %48 {strides = array<i32>} : memref<1x128xf32, #tpu.memory_space<vmem>>, vector<1x128xf32>,
    } else {
    }
    %c1_i32_19 = arith.constant 1 : i32
    %27 = arith.cmpi eq, %arg0, %c1_i32_19 : i32
    %28 = arith.extui %27 : i1 to i32
    %c0_i32_20 = arith.constant 0 : i32
    %29 = arith.cmpi ne, %28, %c0_i32_20 : i32
    scf.if %29 {
      %c0_21 = arith.constant 0 : index
      %c0_22 = arith.constant 0 : index
      %30 = vector.load %arg18[%c0_21, %c0_22] : memref<1x128xf32, #tpu.memory_space<vmem>>, vector<1x128xf32>
      %31 = vector.broadcast %30 : vector<1x128xf32> to vector<128x128xf32>
      %32 = arith.mulf %13, %31 : vector<128x128xf32>
      %c0_23 = arith.constant 0 : index
      %c0_24 = arith.constant 0 : index
      %33 = vector.load %arg19[%c0_23, %c0_24] : memref<1x128xf32, #tpu.memory_space<vmem>>, vector<1x128xf32>
      %34 = vector.broadcast %33 : vector<1x128xf32> to vector<128x128xf32>
      %35 = arith.addf %32, %34 : vector<128x128xf32>
      %cst_25 = arith.constant 0.000000e+00 : f32
      %36 = vector.broadcast %cst_25 : f32 to vector<128x128xf32>
      %37 = arith.subf %36, %35 : vector<128x128xf32>
      %38 = math.exp %37 : vector<128x128xf32>
      %cst_26 = arith.constant 1.000000e+00 : f32
      %39 = vector.broadcast %cst_26 : f32 to vector<128x128xf32>
      %40 = arith.addf %39, %38 : vector<128x128xf32>
      %cst_27 = arith.constant 1.000000e+00 : f32
      %41 = vector.broadcast %cst_27 : f32 to vector<128x128xf32>
      %42 = arith.divf %41, %40 : vector<128x128xf32>
      %c0_28 = arith.constant 0 : index
      %c0_29 = arith.constant 0 : index
      %43 = vector.load %arg10[%c0_28, %c0_29] : memref<1x128xf32, #tpu.memory_space<vmem>>, vector<1x128xf32>
      %cst_30 = arith.constant 1.000000e+00 : f32
      %44 = vector.broadcast %cst_30 : f32 to vector<1x128xf32>
      %45 = arith.subf %44, %43 : vector<1x128xf32>
      %46 = vector.broadcast %45 : vector<1x128xf32> to vector<128x128xf32>
      %47 = arith.mulf %46, %42 : vector<128x128xf32>
      %48 = vector.broadcast %43 : vector<1x128xf32> to vector<128x128xf32>
      %49 = arith.addf %48, %47 : vector<128x128xf32>
      %50 = arith.mulf %13, %49 : vector<128x128xf32>
      %c0_31 = arith.constant 0 : index
      %c0_32 = arith.constant 0 : index
      %51 = vector.load %arg11[%c0_31, %c0_32] : memref<128x128xf32, #tpu.memory_space<vmem>>, vector<128x128xf32>
      %cst_33 = arith.constant dense<0.000000e+00> : vector<128x128xf32>
      %52 = tpu.matmul %50, %51, %cst_33 {dimension_numbers = #tpu.dot_dimension_numbers<[1], [0], [0], [1], [0, 0, 1, 1], [], []>} : vector<128x128xf32>, vector<128x128xf32>, vector<128x128xf32> -> vector<128x128xf32>
      %c0_34 = arith.constant 0 : index
      %c0_35 = arith.constant 0 : index
      %53 = vector.load %arg12[%c0_34, %c0_35] : memref<1x128xf32, #tpu.memory_space<vmem>>, vector<1x128xf32>
      %54 = vector.broadcast %53 : vector<1x128xf32> to vector<128x128xf32>
      %55 = arith.addf %52, %54 : vector<128x128xf32>
      %c0_36 = arith.constant 0 : index
      %c0_37 = arith.constant 0 : index
      %56 = vector.load %arg13[%c0_36, %c0_37] : memref<1x128xf32, #tpu.memory_space<vmem>>, vector<1x128xf32>
      %cst_38 = arith.constant dense<0.000000e+00> : vector<1x128xf32>
      %57 = tpu.matmul %56, %55, %cst_38 {dimension_numbers = #tpu.dot_dimension_numbers<[1], [1], [0], [0], [0, 0, 1, 0], [], []>} : vector<1x128xf32>, vector<128x128xf32>, vector<1x128xf32> -> vector<1x128xf32>
      %c0_39 = arith.constant 0 : index
      %c0_40 = arith.constant 0 : index
      %58 = vector.load %arg14[%c0_39, %c0_40] : memref<1x1xf32, #tpu.memory_space<vmem>>, vector<1x1xf32>
      %59 = vector.broadcast %58 : vector<1x1xf32> to vector<1x128xf32>
      %60 = arith.addf %57, %59 : vector<1x128xf32>
      %c0_41 = arith.constant 0 : index
      %c0_42 = arith.constant 0 : index
      %61 = vector.load %arg15[%c0_41, %c0_42] : memref<1x128xf32, #tpu.memory_space<vmem>>, vector<1x128xf32>
      tpu.vector_store %arg15[%c0_41, %c0_42], %60 {strides = array<i32>} : memref<1x128xf32, #tpu.memory_space<vmem>>, vector<1x128xf32>,
    } else {
    }
    return
  }
  func.func @transform_0(%arg0: i32, %arg1: i32) -> (i32, i32) {
    %c0_i32 = arith.constant 0 : i32
    %c0_i32_0 = arith.constant 0 : i32
    return %arg1, %c0_i32 : i32, i32
  }
  func.func @transform_1(%arg0: i32, %arg1: i32) -> (i32, i32) {
    %c0_i32 = arith.constant 0 : i32
    %c0_i32_0 = arith.constant 0 : i32
    return %arg1, %c0_i32 : i32, i32
  }
  func.func @transform_2(%arg0: i32, %arg1: i32) -> (i32, i32) {
    %c0_i32 = arith.constant 0 : i32
    %c0_i32_0 = arith.constant 0 : i32
    %c0_i32_1 = arith.constant 0 : i32
    return %c0_i32, %c0_i32_0 : i32, i32
  }
  func.func @transform_3(%arg0: i32, %arg1: i32) -> (i32, i32) {
    %c0_i32 = arith.constant 0 : i32
    %c0_i32_0 = arith.constant 0 : i32
    %c0_i32_1 = arith.constant 0 : i32
    return %c0_i32, %c0_i32_0 : i32, i32
  }
  func.func @transform_4(%arg0: i32, %arg1: i32) -> (i32, i32) {
    %c0_i32 = arith.constant 0 : i32
    %c0_i32_0 = arith.constant 0 : i32
    %c0_i32_1 = arith.constant 0 : i32
    return %c0_i32, %c0_i32_0 : i32, i32
  }
  func.func @transform_5(%arg0: i32, %arg1: i32) -> (i32, i32) {
    %c0_i32 = arith.constant 0 : i32
    %c0_i32_0 = arith.constant 0 : i32
    %c0_i32_1 = arith.constant 0 : i32
    return %c0_i32, %c0_i32_0 : i32, i32
  }
  func.func @transform_6(%arg0: i32, %arg1: i32) -> (i32, i32) {
    %c0_i32 = arith.constant 0 : i32
    %c0_i32_0 = arith.constant 0 : i32
    %c0_i32_1 = arith.constant 0 : i32
    return %c0_i32, %c0_i32_0 : i32, i32
  }
  func.func @transform_7(%arg0: i32, %arg1: i32) -> (i32, i32) {
    %c0_i32 = arith.constant 0 : i32
    %c0_i32_0 = arith.constant 0 : i32
    %c0_i32_1 = arith.constant 0 : i32
    return %c0_i32, %c0_i32_0 : i32, i32
  }
  func.func @transform_8(%arg0: i32, %arg1: i32) -> (i32, i32) {
    %c0_i32 = arith.constant 0 : i32
    %c0_i32_0 = arith.constant 0 : i32
    %c0_i32_1 = arith.constant 0 : i32
    return %c0_i32, %c0_i32_0 : i32, i32
  }
  func.func @transform_9(%arg0: i32, %arg1: i32) -> (i32, i32) {
    %c0_i32 = arith.constant 0 : i32
    %c0_i32_0 = arith.constant 0 : i32
    %c0_i32_1 = arith.constant 0 : i32
    return %c0_i32, %c0_i32_0 : i32, i32
  }
  func.func @transform_10(%arg0: i32, %arg1: i32) -> (i32, i32) {
    %c0_i32 = arith.constant 0 : i32
    %c0_i32_0 = arith.constant 0 : i32
    %c0_i32_1 = arith.constant 0 : i32
    return %c0_i32, %c0_i32_0 : i32, i32
  }
  func.func @transform_11(%arg0: i32, %arg1: i32) -> (i32, i32) {
    %c0_i32 = arith.constant 0 : i32
    %c0_i32_0 = arith.constant 0 : i32
    %c0_i32_1 = arith.constant 0 : i32
    return %c0_i32, %c0_i32_0 : i32, i32
  }
  func.func @transform_12(%arg0: i32, %arg1: i32) -> (i32, i32) {
    %c0_i32 = arith.constant 0 : i32
    %c0_i32_0 = arith.constant 0 : i32
    %c0_i32_1 = arith.constant 0 : i32
    return %c0_i32, %c0_i32_0 : i32, i32
  }
  func.func @transform_13(%arg0: i32, %arg1: i32) -> (i32, i32) {
    %0 = arith.muli %arg1, %arg0 : i32
    %c0_i32 = arith.constant 0 : i32
    %c0_i32_0 = arith.constant 0 : i32
    return %c0_i32, %0 : i32, i32
  }
}

</mosaic_0001>

<bundles_post_ra>
// kernel: tpu_custom_call.1
= control target key start
LH: loop header
LB: loop body
LE: loop exit
PB: predicated region body
PF: predicated region fallthrough
CT: control target
= control target key end

     0   :  { %s3019_s0 = inlined_call_operand.vmem [shape: f32[128,4], index: 0, kind: input, shape index: {}]   ;;  %s3020_s1 = inlined_call_operand.vmem [shape: f32[128,4], index: 1, kind: input, shape index: {}]   ;;  %s3021_s2 = inlined_call_operand.vmem [shape: f32[4,128], index: 2, kind: input, shape index: {}]   ;;  %s3022_s3 = inlined_call_operand.vmem [shape: f32[4,128], index: 3, kind: input, shape index: {}]   ;;  %s3023_s4 = inlined_call_operand.vmem [shape: f32[4,128], index: 4, kind: input, shape index: {}]   ;;  %s3024_s5 = inlined_call_operand.vmem [shape: f32[1,128], index: 5, kind: input, shape index: {}]   ;;  %s3025_s6 = inlined_call_operand.vmem [shape: f32[1,128], index: 6, kind: input, shape index: {}]   ;;  %s3026_s7 = inlined_call_operand.vmem [shape: f32[1,128], index: 7, kind: input, shape index: {}]   ;;  %s3027_s8 = inlined_call_operand.vmem [shape: f32[1,128], index: 8, kind: input, shape index: {}]   ;;  %s3028_s9 = inlined_call_operand.vmem [shape: f32[128,128], index: 9, kind: input, shape index: {}]   ;;  %s3029_s10 = inlined_call_operand.vmem [shape: f32[1,128], index: 10, kind: input, shape index: {}]   ;;  %s3030_s11 = inlined_call_operand.vmem [shape: f32[1,128], index: 11, kind: input, shape index: {}]   ;;  %s3031_s12 = inlined_call_operand.<no memory space> [shape: f32[1,1], index: 12, kind: input, shape index: {}]   ;;  %s3032_s13 = inlined_call_operand.hbm [shape: f32[1,128], index: 13, kind: output, shape index: {}]  }
   0x1   :  { %v18_v0 = vstv %s3031_s12 }
   0x2   :  { %19 = vst [vmem:[#allocation6] sm:$0x1] %v18_v0 }
   0x3   :  { %20 = vsyncpa [#allocation8], 0 }
   0x4   :  { %22 = vsyncpa [#allocation8 + $0x1], 0  ;;  %s2577_s27 = smov 0   ;;  %s2579_s28 = smov 0  }
   0x5   :  { %s2581_s29 = smov 0  }
   0x6 LB: > { %s1906_s12 = sadd.s32 4294967295, %s2496_s29   ;;  %s1907_s30 = sadd.s32 4294967294, %s2496_s29   ;;  %s2496_s29 = sphi %s2581_s29, %s28_s29   ;;  %s2492_s28 = sphi %s2579_s28, %s3035_s28   ;;  %s2488_s27 = sphi %s2577_s27, %s3034_s27  }
   0x7   : > { %s40_s14 = sadd.s32 1, %s2492_s28  ;;  %p1911_p0 = scmp.ge.s32.totalorder %s2496_s29, 1 }
   0x8   : > { %p42_p1 = scmp.ge.s32.totalorder %s40_s14, 2  ;;  %p418_p2 = scmp.lt.s32.totalorder %s2496_s29, 3 }
   0xa   : > { %s3037_s14 = smov (%p42_p1, %s40_s14), 0  ;;  %p419_p3 = pnand %p1911_p0, %p418_p2 }
   0xb   : > { %v512_v1 = vld [vmem:[%s3022_s3] sm:$0xf] (!%p419_p3)  ;;  %vm562_vm0 = vcmask (!%p419_p3), 1043456   ;;  %vm513_vm1 = vcmask (!%p419_p3), 31744   ;;  %v496_v5 = vld [vmem:[%s3020_s1 + $0x8] sm:$0xff] (!%p419_p3)  ;;  %v497_v8 = vld [vmem:[%s3020_s1 + $0x10] sm:$0xff] (!%p419_p3) }
   0xc   : > { %422 = sbr.rel (%p419_p3) target bundleno = 891 (0x37b), region = 72  ;;  %v511_v2 = vld [vmem:[%s3021_s2] sm:$0xf] (!%p419_p3)  ;;  %2077 = vmatprep.subr.msk.mxu1 (!%p419_p3), %vm562_vm0, %v512_v1  ;;  %v480_v6 = vld [vmem:[%s3019_s0 + $0x8] sm:$0xff] (!%p419_p3)  ;;  %v481_v9 = vld [vmem:[%s3019_s0 + $0x10] sm:$0xff] (!%p419_p3)  ;;  %p1159_p4 = scmp.eq.s32.totalorder (!%p419_p3), %s2488_s27, 0 }
   0xd   : > { %v495_v3 = vld [vmem:[%s3020_s1] sm:$0xff] (!%p419_p3)  ;;  %2103 = vmatprep.subr.msk.mxu0 (!%p419_p3), %vm562_vm0, %v511_v2  ;;  %2078 = vmatpush3.msk.msra.mxu1 (!%p419_p3), %vm562_vm0, %v512_v1  ;;  %v498_v10 = vld [vmem:[%s3020_s1 + $0x18] sm:$0xff] (!%p419_p3)  ;;  %v500_v14 = vld [vmem:[%s3020_s1 + $0x28] sm:$0xff] (!%p419_p3)  ;;  %v908_v22 = vmul.f32 (!%p419_p3), %v496_v5, %v480_v6  ;;  %v909_v24 = vmul.f32 (!%p419_p3), %v497_v8, %v481_v9 }
   0xe   : > { %v479_v4 = vld [vmem:[%s3019_s0] sm:$0xff] (!%p419_p3)  ;;  %2079 = vmatprep.mubr.msk.f32.mxu1 (!%p419_p3), %vm513_vm1, %v495_v3  ;;  %2104 = vmatpush3.msk.msra.mxu0 (!%p419_p3), %vm562_vm0, %v511_v2  ;;  %v482_v11 = vld [vmem:[%s3019_s0 + $0x18] sm:$0xff] (!%p419_p3)  ;;  %v484_v15 = vld [vmem:[%s3019_s0 + $0x28] sm:$0xff] (!%p419_p3) }
   0xf   : > { %v923_v7 = vld [vmem:[%s3023_s4] sm:$0xf] (!%p419_p3)  ;;  %2105 = vmatprep.mubr.msk.f32.mxu0 (!%p419_p3), %vm513_vm1, %v479_v4  ;;  %2080 = vmatmul.mubr.msk.f32.vlgmr.msra.gmra.mrb[0].mxu1 (!%p419_p3), %vm513_vm1, %v496_v5  ;;  %v501_v16 = vld [vmem:[%s3020_s1 + $0x30] sm:$0xff] (!%p419_p3)  ;;  %v502_v18 = vld [vmem:[%s3020_s1 + $0x38] sm:$0xff] (!%p419_p3)  ;;  %v907_v19 = vmul.f32 (!%p419_p3), %v495_v3, %v479_v4  ;;  %v910_v26 = vmul.f32 (!%p419_p3), %v498_v10, %v482_v11  ;;  %v912_v30 = vmul.f32 (!%p419_p3), %v500_v14, %v484_v15 }
  0x10   : > { %2302 = vmatprep.subr.msk.mxu1 (!%p419_p3), %vm562_vm0, %v511_v2  ;;  %2106 = vmatmul.mubr.msk.f32.vlgmr.msra.gmra.mrb[0].mxu0 (!%p419_p3), %vm513_vm1, %v480_v6  ;;  %v499_v12 = vld [vmem:[%s3020_s1 + $0x20] sm:$0xff] (!%p419_p3)  ;;  %v485_v17 = vld [vmem:[%s3019_s0 + $0x30] sm:$0xff] (!%p419_p3)  ;;  %v486_v20 = vld [vmem:[%s3019_s0 + $0x38] sm:$0xff] (!%p419_p3) }
  0x11   : > { %2129 = vmatprep.subr.msk.mxu0 (!%p419_p3), %vm562_vm0, %v923_v7  ;;  %2303 = vmatpush3.msk.msra.mxu1 (!%p419_p3), %vm562_vm0, %v511_v2  ;;  %v483_v13 = vld [vmem:[%s3019_s0 + $0x20] sm:$0xff] (!%p419_p3)  ;;  %v504_v23 = vld [vmem:[%s3020_s1 + $0x48] sm:$0xff] (!%p419_p3)  ;;  %v505_v25 = vld [vmem:[%s3020_s1 + $0x50] sm:$0xff] (!%p419_p3)  ;;  %v913_v32 = vmul.f32 (!%p419_p3), %v501_v16, %v485_v17  ;;  %v914_v35 = vmul.f32 (!%p419_p3), %v502_v18, %v486_v20 }
  0x12   : > { %2130 = vmatpush3.msk.msra.mxu0 (!%p419_p3), %vm562_vm0, %v923_v7  ;;  %2082 = vmatprep.mubr.msk.f32.mxu1 (!%p419_p3), %vm513_vm1, %v497_v8  ;;  %v503_v21 = vld [vmem:[%s3020_s1 + $0x40] sm:$0xff] (!%p419_p3)  ;;  %v506_v27 = vld [vmem:[%s3020_s1 + $0x58] sm:$0xff] (!%p419_p3)  ;;  %v911_v28 = vmul.f32 (!%p419_p3), %v499_v12, %v483_v13  ;;  %v508_v31 = vld [vmem:[%s3020_s1 + $0x68] sm:$0xff] (!%p419_p3) }
  0x13   : > { %2108 = vmatprep.mubr.msk.f32.mxu0 %vm513_vm1, %v481_v9  ;;  %2083 = vmatmul.mubr.msk.f32.gmra.mrb[2].mxu1 %vm513_vm1, %v498_v10  ;;  %v507_v29 = vld [vmem:[%s3020_s1 + $0x60] sm:$0xff]  ;;  %v509_v33 = vld [vmem:[%s3020_s1 + $0x70] sm:$0xff]  ;;  %v510_v36 = vld [vmem:[%s3020_s1 + $0x78] sm:$0xff] }
  0x14   : > { %2109 = vmatmul.mubr.msk.f32.gmra.mrb[2].mxu0 %vm513_vm1, %v482_v11  ;;  %2085 = vmatprep.mubr.msk.f32.mxu1 %vm513_vm1, %v499_v12  ;;  %v487_v34 = vld [vmem:[%s3019_s0 + $0x40] sm:$0xff]  ;;  %v488_v37 = vld [vmem:[%s3019_s0 + $0x48] sm:$0xff]  ;;  %v489_v39 = vld [vmem:[%s3019_s0 + $0x50] sm:$0xff] }
  0x15   : > { %2111 = vmatprep.mubr.msk.f32.mxu0 %vm513_vm1, %v483_v13  ;;  %v915_v38 = vmul.f32 %v503_v21, %v487_v34  ;;  %v916_v40 = vmul.f32 %v504_v23, %v488_v37  ;;  %v917_v41 = vmul.f32 %v505_v25, %v489_v39  ;;  %v490_v42 = vld [vmem:[%s3019_s0 + $0x58] sm:$0xff]  ;;  %v491_v43 = vld [vmem:[%s3019_s0 + $0x60] sm:$0xff]  ;;  %v492_v46 = vld [vmem:[%s3019_s0 + $0x68] sm:$0xff] }
  0x16   : > { %v918_v44 = vmul.f32 %v506_v27, %v490_v42  ;;  %v919_v45 = vmul.f32 %v507_v29, %v491_v43  ;;  %v493_v47 = vld [vmem:[%s3019_s0 + $0x70] sm:$0xff]  ;;  %v920_v48 = vmul.f32 %v508_v31, %v492_v46  ;;  %v494_v50 = vld [vmem:[%s3019_s0 + $0x78] sm:$0xff]  ;;  %v1963_v61 = vld [vmem:[%s3024_s5] ss:$0 sm:$0xff] }
  0x17   : > { %2086 = vmatmul.mubr.msk.f32.gmra.mrb[4].mxu1 %vm513_vm1, %v500_v14  ;;  %v921_v49 = vmul.f32 %v509_v33, %v493_v47  ;;  %v922_v51 = vmul.f32 %v510_v36, %v494_v50 }
  0x18   : > { %2112 = vmatmul.mubr.msk.f32.gmra.mrb[4].mxu0 %vm513_vm1, %v484_v15  ;;  %2088 = vmatprep.mubr.msk.f32.mxu1 %vm513_vm1, %v501_v16 }
  0x19   : > { %2114 = vmatprep.mubr.msk.f32.mxu0 %vm513_vm1, %v485_v17 }
  0x1b   : > { %2089 = vmatmul.mubr.msk.f32.gmra.mrb[6].mxu1 %vm513_vm1, %v502_v18 }
  0x1c   : > { %2115 = vmatmul.mubr.msk.f32.gmra.mrb[6].mxu0 %vm513_vm1, %v486_v20  ;;  %2091 = vmatprep.mubr.msk.f32.mxu1 %vm513_vm1, %v503_v21 }
  0x1d   : > { %2131 = vmatprep.mubr.msk.f32.mxu0 %vm513_vm1, %v907_v19 }
  0x1f   : > { %2092 = vmatmul.mubr.msk.f32.gmra.mrb[8].mxu1 %vm513_vm1, %v504_v23 }
  0x20   : > { %2132 = vmatmul.mubr.msk.f32.vlgmr.msra.gmra.mrb[0].mxu0 %vm513_vm1, %v908_v22  ;;  %2094 = vmatprep.mubr.msk.f32.mxu1 %vm513_vm1, %v505_v25 }
  0x21   : > { %2134 = vmatprep.mubr.msk.f32.mxu0 %vm513_vm1, %v909_v24 }
  0x23   : > { %2095 = vmatmul.mubr.msk.f32.gmra.mrb[10].mxu1 %vm513_vm1, %v506_v27 }
  0x24   : > { %2135 = vmatmul.mubr.msk.f32.gmra.mrb[2].mxu0 %vm513_vm1, %v910_v26  ;;  %2097 = vmatprep.mubr.msk.f32.mxu1 %vm513_vm1, %v507_v29 }
  0x25   : > { %2137 = vmatprep.mubr.msk.f32.mxu0 %vm513_vm1, %v911_v28 }
  0x27   : > { %2098 = vmatmul.mubr.msk.f32.gmra.mrb[12].mxu1 %vm513_vm1, %v508_v31 }
  0x28   : > { %2138 = vmatmul.mubr.msk.f32.gmra.mrb[4].mxu0 %vm513_vm1, %v912_v30  ;;  %2100 = vmatprep.mubr.msk.f32.mxu1 %vm513_vm1, %v509_v33 }
  0x29   : > { %2140 = vmatprep.mubr.msk.f32.mxu0 %vm513_vm1, %v913_v32 }
  0x2b   : > { %2101 = vmatmul.mubr.msk.f32.gmra.mrb[14].mxu1 %vm513_vm1, %v510_v36 }
  0x2c   : > { %2141 = vmatmul.mubr.msk.f32.gmra.mrb[6].mxu0 %vm513_vm1, %v914_v35  ;;  %2117 = vmatprep.mubr.msk.f32.mxu1 %vm513_vm1, %v487_v34 }
  0x2d   : > { %2143 = vmatprep.mubr.msk.f32.mxu0 %vm513_vm1, %v915_v38 }
  0x2f   : > { %2118 = vmatmul.mubr.msk.f32.vlgmr.msra.gmra.mrb[8].mxu1 %vm513_vm1, %v488_v37 }
  0x30   : > { %2144 = vmatmul.mubr.msk.f32.gmra.mrb[8].mxu0 %vm513_vm1, %v916_v40  ;;  %2120 = vmatprep.mubr.msk.f32.mxu1 %vm513_vm1, %v489_v39 }
  0x31   : > { %2146 = vmatprep.mubr.msk.f32.mxu0 %vm513_vm1, %v917_v41 }
  0x33   : > { %2121 = vmatmul.mubr.msk.f32.gmra.mrb[10].mxu1 %vm513_vm1, %v490_v42 }
  0x34   : > { %2147 = vmatmul.mubr.msk.f32.gmra.mrb[10].mxu0 %vm513_vm1, %v918_v44  ;;  %2123 = vmatprep.mubr.msk.f32.mxu1 %vm513_vm1, %v491_v43 }
  0x35   : > { %2149 = vmatprep.mubr.msk.f32.mxu0 %vm513_vm1, %v919_v45 }
  0x37   : > { %2124 = vmatmul.mubr.msk.f32.gmra.mrb[12].mxu1 %vm513_vm1, %v492_v46 }
  0x38   : > { %2150 = vmatmul.mubr.msk.f32.gmra.mrb[12].mxu0 %vm513_vm1, %v920_v48  ;;  %2126 = vmatprep.mubr.msk.f32.mxu1 %vm513_vm1, %v493_v47 }
  0x39   : > { %2152 = vmatprep.mubr.msk.f32.mxu0 %vm513_vm1, %v921_v49 }
  0x3b   : > { %2127 = vmatmul.mubr.msk.f32.gmra.mrb[14].mxu1 %vm513_vm1, %v494_v50 }
  0x3c   : > { %2153 = vmatmul.mubr.msk.f32.gmra.mrb[14].mxu0 %vm513_vm1, %v922_v51 }
  0xe2   : > { %v2081_v52 = vpop.f32.mrb[0].mxu1 }
  0xe3   : > { %v632_v53 = vpop.f32.mrb[1].mxu1 }
  0xe6   : > { %v2084_v54 = vpop.f32.mrb[2].mxu1 }
  0xe7   : > { %v642_v55 = vpop.f32.mrb[3].mxu1 }
  0xea   : > { %v2087_v56 = vpop.f32.mrb[4].mxu1 }
  0xeb   : > { %v652_v57 = vpop.f32.mrb[5].mxu1 }
  0xee   : > { %v2090_v58 = vpop.f32.mrb[6].mxu1 }
  0xef   : > { %v662_v59 = vpop.f32.mrb[7].mxu1 }
  0xf3   : > { %v2133_v60 = vpop.f32.mrb[0].mxu0 }
  0xf4   : > { %v2304_v62 = vadd.f32 %v2133_v60, %v2081_v52  ;;  %v1041_v63 = vpop.f32.mrb[1].mxu0 }
  0xf5   : > { %v2305_v0 = vadd.f32 %v1041_v63, %v632_v53  ;;  %v2498_v53 = vmov (%p1159_p4), 0.0  }
  0xf6   : > { %v2764_v1 = vadd.f32 %v2304_v62, %v1963_v61  ;;  %1165 = vst [vmem:[#allocation2] sm:$0x1] (%p1159_p4), %v2498_v53  ;;  %1166 = vst [vmem:[#allocation3] sm:$0x1] (%p1159_p4), %v2498_v53 }
  0xf7   : > { %v2766_v2 = vadd.f32 %v2305_v0, %v1963_v61  ;;  %v2136_v3 = vpop.f32.mrb[2].mxu0 }
  0xf8   : > { %v2306_v4 = vadd.f32 %v2136_v3, %v2084_v54  ;;  %v1051_v5 = vpop.f32.mrb[3].mxu0 }
  0xf9   : > { %v2307_v6 = vadd.f32 %v1051_v5, %v642_v55 }
  0xfa   : > { %v2768_v7 = vadd.f32 %v2306_v4, %v1963_v61 }
  0xfb   : > { %v2770_v8 = vadd.f32 %v2307_v6, %v1963_v61  ;;  %v2139_v9 = vpop.f32.mrb[4].mxu0 }
  0xfc   : > { %v2308_v10 = vadd.f32 %v2139_v9, %v2087_v56  ;;  %v1061_v11 = vpop.f32.mrb[5].mxu0 }
  0xfd   : > { %v2309_v12 = vadd.f32 %v1061_v11, %v652_v57 }
  0xfe   : > { %v2772_v13 = vadd.f32 %v2308_v10, %v1963_v61 }
  0xff   : > { %v2774_v14 = vadd.f32 %v2309_v12, %v1963_v61  ;;  %v2142_v15 = vpop.f32.mrb[6].mxu0 }
 0x100   : > { %v2310_v16 = vadd.f32 %v2142_v15, %v2090_v58  ;;  %v1071_v17 = vpop.f32.mrb[7].mxu0 }
 0x101   : > { %v2311_v18 = vadd.f32 %v1071_v17, %v662_v59 }
 0x102   : > { %v2776_v19 = vadd.f32 %v2310_v16, %v1963_v61  ;;  %v2119_v20 = vpop.f32.mrb[8].mxu1 }
 0x103   : > { %v2778_v21 = vadd.f32 %v2311_v18, %v1963_v61  ;;  %v2145_v22 = vpop.f32.mrb[8].mxu0  ;;  %v868_v23 = vpop.f32.mrb[9].mxu1 }
 0x104   : > { %v2312_v24 = vadd.f32 %v2145_v22, %v2119_v20  ;;  %v1081_v25 = vpop.f32.mrb[9].mxu0 }
 0x105   : > { %v2313_v26 = vadd.f32 %v1081_v25, %v868_v23 }
 0x106   : > { %v2780_v27 = vadd.f32 %v2312_v24, %v1963_v61  ;;  %v2122_v28 = vpop.f32.mrb[10].mxu1 }
 0x107   : > { %v2782_v29 = vadd.f32 %v2313_v26, %v1963_v61  ;;  %v2148_v30 = vpop.f32.mrb[10].mxu0  ;;  %v878_v31 = vpop.f32.mrb[11].mxu1 }
 0x108   : > { %v2314_v32 = vadd.f32 %v2148_v30, %v2122_v28  ;;  %v1091_v33 = vpop.f32.mrb[11].mxu0 }
 0x109   : > { %v2315_v34 = vadd.f32 %v1091_v33, %v878_v31 }
 0x10a   : > { %v2784_v35 = vadd.f32 %v2314_v32, %v1963_v61  ;;  %v2125_v36 = vpop.f32.mrb[12].mxu1 }
 0x10b   : > { %v2786_v37 = vadd.f32 %v2315_v34, %v1963_v61  ;;  %v2151_v38 = vpop.f32.mrb[12].mxu0  ;;  %v888_v39 = vpop.f32.mrb[13].mxu1 }
 0x10c   : > { %v2316_v40 = vadd.f32 %v2151_v38, %v2125_v36  ;;  %v1101_v41 = vpop.f32.mrb[13].mxu0 }
 0x10d   : > { %v2317_v42 = vadd.f32 %v1101_v41, %v888_v39  ;;  %1164 = sbr.rel (!%p1159_p4) target bundleno = 276 (0x114), region = 76 }
 0x10e   : > { %v2788_v43 = vadd.f32 %v2316_v40, %v1963_v61  ;;  %v2128_v44 = vpop.f32.mrb[14].mxu1 }
 0x10f   : > { %v2790_v45 = vadd.f32 %v2317_v42, %v1963_v61  ;;  %v2154_v46 = vpop.f32.mrb[14].mxu0  ;;  %v898_v47 = vpop.f32.mrb[15].mxu1 }
 0x110   : > { %v2318_v48 = vadd.f32 %v2154_v46, %v2128_v44  ;;  %v1111_v49 = vpop.f32.mrb[15].mxu0 }
 0x111   : > { %v2319_v50 = vadd.f32 %v1111_v49, %v898_v47 }
 0x112   : > { %v2792_v51 = vadd.f32 %v2318_v48, %v1963_v61 }
 0x113   : > { %v2794_v52 = vadd.f32 %v2319_v50, %v1963_v61 }
 0x114 PF: > { %p1965_p5 = scmp.ne.s32.totalorder %s2488_s27, 0 }
 0x115   : > { %v1270_v54 = vadd.f32 (!%p1965_p5), %v2764_v1, %v2766_v2  ;;  %v1294_v55 = vmul.f32 (!%p1965_p5), %v2766_v2, %v2766_v2  ;;  %v1295_v56 = vmul.f32 (!%p1965_p5), %v2764_v1, %v2764_v1  ;;  %v1269_v5 = vld [vmem:[#allocation2] sm:$0x1] (!%p1965_p5)  ;;  %v1293_v10 = vld [vmem:[#allocation3] sm:$0x1] (!%p1965_p5) }
 0x116   : > { %1169 = sbr.rel (%p1965_p5) target bundleno = 296 (0x128), region = 80 }
 0x117   : > { %v1285_v57 = vrot.slane (!%p1965_p5), %v1270_v54, 4  ;;  %v1310_v58 = vadd.f32 (!%p1965_p5), %v1295_v56, %v1294_v55 }
 0x119   : > { %v1286_v59 = vadd.f32 (!%p1965_p5), %v1285_v57, %v1270_v54  ;;  %v1325_v60 = vrot.slane (!%p1965_p5), %v1310_v58, 4 }
 0x11b   : > { %v1287_v61 = vrot.slane (!%p1965_p5), %v1286_v59, 2  ;;  %v1326_v62 = vadd.f32 (!%p1965_p5), %v1325_v60, %v1310_v58 }
 0x11d   : > { %v1288_v63 = vadd.f32 %v1287_v61, %v1286_v59  ;;  %v1327_v0 = vrot.slane %v1326_v62, 2 }
 0x11f   : > { %v1289_v3 = vrot.slane %v1288_v63, 1  ;;  %v1328_v4 = vadd.f32 %v1327_v0, %v1326_v62 }
 0x121   : > { %v1290_v6 = vadd.f32 %v1289_v3, %v1288_v63  ;;  %v1329_v9 = vrot.slane %v1328_v4, 1 }
 0x123   : > { %v1291_v11 = vadd.f32 %v1290_v6, %v1269_v5  ;;  %v1330_v12 = vadd.f32 %v1329_v9, %v1328_v4 }
 0x125   : > { %1292 = vst [vmem:[#allocation2] sm:$0x1] %v1291_v11  ;;  %v1331_v15 = vadd.f32 %v1330_v12, %v1293_v10 }
 0x127   : > { %1332 = vst [vmem:[#allocation3] sm:$0x1] %v1331_v15 }
 0x128 PF: > { %p1333_p6 = scmp.eq.s32.totalorder %s2488_s27, 1 }
 0x129   : > { %v1345_v26 = vld [vmem:[%s3025_s6] sm:$0x1] (%p1333_p6) }
 0x12a   : > { %1337 = sbr.rel (!%p1333_p6) target bundleno = 329 (0x149), region = 84  ;;  %v1350_v31 = vld [vmem:[%s3026_s7] sm:$0x1] (%p1333_p6) }
 0x12c   : > { %v1338_v16 = vld [vmem:[#allocation2] sm:$0x1] (%p1333_p6) }
 0x12d   : > { %v1339_v18 = vmul.f32 (%p1333_p6), 0.0625, %v1338_v16 }
 0x12e   : > { %v1340_v17 = vld [vmem:[#allocation3] sm:$0x1] (%p1333_p6) }
 0x12f   : > { %v1341_v20 = vmul.f32 (%p1333_p6), 0.0625, %v1340_v17  ;;  %v1342_v22 = vmul.f32 (%p1333_p6), %v1339_v18, %v1339_v18 }
 0x131   : > { %v1343_v23 = vsub.f32 %v1341_v20, %v1342_v22 }
 0x133   : > { %v1344_v24 = vmax.f32 %v1343_v23, 0.0 }
 0x135   : > { %v1346_v25 = vadd.f32 1e-08, %v1344_v24 }
 0x137   : > { %2377 = vrsqrt.f32 %v1346_v25 }
 0x141   : > { %v2378_v28 = vpop.eup %2377 }
 0x142   : > { %v1348_v30 = vmul.f32 %v2378_v28, %v1345_v26 }
 0x144   : > { %1349 = vst [vmem:[#allocation4] sm:$0x1] %v1348_v30  ;;  %v1351_v32 = vmul.f32 %v1348_v30, %v1339_v18 }
 0x146   : > { %v1352_v33 = vsub.f32 %v1350_v31, %v1351_v32 }
 0x148   : > { %1353 = vst [vmem:[#allocation5] sm:$0x1] %v1352_v33 }
 0x149 PF: > { %p1967_p7 = scmp.ne.s32.totalorder %s2488_s27, 1 }
 0x14a   : > { %v1561_v34 = vld [vmem:[%s3028_s9] sm:$0xff] (!%p1967_p7)  ;;  %v1562_v36 = vld [vmem:[%s3028_s9 + $0x8] sm:$0xff] (!%p1967_p7)  ;;  %v1563_v38 = vld [vmem:[%s3028_s9 + $0x10] sm:$0xff] (!%p1967_p7)  ;;  %vm2500_vm2 = vmmov (!%p1967_p7), 0  }
 0x14b   : > { %1356 = sbr.rel (%p1967_p7) target bundleno = 868 (0x364), region = 88  ;;  %v2246_v39 = vpack.c.bf16 (!%p1967_p7), %v1562_v36, %v1561_v34  ;;  %v1564_v40 = vld [vmem:[%s3028_s9 + $0x18] sm:$0xff] (!%p1967_p7)  ;;  %v1565_v42 = vld [vmem:[%s3028_s9 + $0x20] sm:$0xff] (!%p1967_p7)  ;;  %v1566_v44 = vld [vmem:[%s3028_s9 + $0x28] sm:$0xff] (!%p1967_p7) }
 0x14c   : > { %v2250_v41 = vpack.c.bf16 (!%p1967_p7), %v1564_v40, %v1563_v38  ;;  %v1567_v46 = vld [vmem:[%s3028_s9 + $0x30] sm:$0xff] (!%p1967_p7)  ;;  %v1568_v47 = vld [vmem:[%s3028_s9 + $0x38] sm:$0xff] (!%p1967_p7)  ;;  %v1569_v48 = vld [vmem:[%s3028_s9 + $0x40] sm:$0xff] (!%p1967_p7)  ;;  %v2254_v50 = vpack.c.bf16 (!%p1967_p7), %v1566_v44, %v1565_v42 }
 0x14d   : > { %2247 = vmatprep.subr.bf16.mxu0 (!%p1967_p7), %v2246_v39  ;;  %v1570_v49 = vld [vmem:[%s3028_s9 + $0x48] sm:$0xff] (!%p1967_p7)  ;;  %v2843_v53 = vld [vmem:[#allocation4] ss:$0 sm:$0xff] (!%p1967_p7)  ;;  %v1571_v55 = vld [vmem:[%s3028_s9 + $0x50] sm:$0xff] (!%p1967_p7)  ;;  %v2258_v60 = vpack.c.bf16 (!%p1967_p7), %v1568_v47, %v1567_v46 }
 0x14e   : > { %2249 = vmatpush3.bf16.msra.mxu0 (!%p1967_p7), %v2246_v39  ;;  %v1572_v56 = vld [vmem:[%s3028_s9 + $0x58] sm:$0xff] (!%p1967_p7)  ;;  %v1364_v57 = vmul.f32 (!%p1967_p7), %v2843_v53, %v2766_v2  ;;  %v1365_v58 = vmul.f32 (!%p1967_p7), %v2843_v53, %v2764_v1  ;;  %v1366_v59 = vmul.f32 (!%p1967_p7), %v2843_v53, %v2770_v8  ;;  %v2262_v61 = vpack.c.bf16 (!%p1967_p7), %v1570_v49, %v1569_v48  ;;  %v1573_v47 = vld [vmem:[%s3028_s9 + $0x60] sm:$0xff] (!%p1967_p7)  ;;  %v1574_v48 = vld [vmem:[%s3028_s9 + $0x68] sm:$0xff] (!%p1967_p7) }
 0x14f   : > { %2251 = vmatprep.subr.bf16.mxu0 (!%p1967_p7), %v2250_v41  ;;  %v2845_v54 = vld [vmem:[#allocation5] ss:$0 sm:$0xff] (!%p1967_p7)  ;;  %v1367_v62 = vmul.f32 (!%p1967_p7), %v2843_v53, %v2768_v7  ;;  %v1368_v63 = vmul.f32 (!%p1967_p7), %v2843_v53, %v2774_v14  ;;  %v1369_v5 = vmul.f32 (!%p1967_p7), %v2843_v53, %v2772_v13  ;;  %v2868_v6 = vpack.c.bf16 (!%p1967_p7), %v1572_v56, %v1571_v55 }
 0x150   : > { %v1387_v0 = vadd.f32 (!%p1967_p7), %v2845_v54, %v1364_v57  ;;  %v1388_v3 = vadd.f32 (!%p1967_p7), %v2845_v54, %v1365_v58  ;;  %v1389_v4 = vadd.f32 (!%p1967_p7), %v2845_v54, %v1366_v59  ;;  %v1370_v11 = vmul.f32 (!%p1967_p7), %v2843_v53, %v2778_v21 }
 0x151   : > { %v1390_v9 = vadd.f32 (!%p1967_p7), %v2845_v54, %v1367_v62  ;;  %v1391_v10 = vadd.f32 (!%p1967_p7), %v2845_v54, %v1368_v63  ;;  %v1392_v17 = vadd.f32 (!%p1967_p7), %v2845_v54, %v1369_v5  ;;  %v1371_v23 = vmul.f32 (!%p1967_p7), %v2843_v53, %v2776_v19 }
 0x152   : > { %2253 = vmatpush3.bf16.msra.mxu0 %v2250_v41  ;;  %v1403_v12 = vsub.f32 0.0, %v1387_v0  ;;  %v1404_v15 = vsub.f32 0.0, %v1388_v3  ;;  %v1405_v16 = vsub.f32 0.0, %v1389_v4  ;;  %v1393_v22 = vadd.f32 %v2845_v54, %v1370_v11  ;;  %v1576_v11 = vld [vmem:[%s3028_s9 + $0x78] sm:$0xff] }
 0x153   : > { %2255 = vmatprep.subr.bf16.mxu0 %v2254_v50  ;;  %v1406_v18 = vsub.f32 0.0, %v1390_v9  ;;  %v1407_v20 = vsub.f32 0.0, %v1391_v10  ;;  %v1372_v28 = vmul.f32 %v2843_v53, %v2782_v29  ;;  %v1408_v32 = vsub.f32 0.0, %v1392_v17  ;;  %v1575_v10 = vld [vmem:[%s3028_s9 + $0x70] sm:$0xff] }
 0x154   : > { %v1419_v24 = vmul.f32 1.442695, %v1403_v12  ;;  %v1421_v25 = vmul.f32 1.442695, %v1404_v15  ;;  %v1423_v26 = vmul.f32 1.442695, %v1405_v16  ;;  %v1394_v34 = vadd.f32 %v2845_v54, %v1371_v23 }
 0x155   : > { %v1425_v30 = vmul.f32 1.442695, %v1406_v18  ;;  %v1427_v31 = vmul.f32 1.442695, %v1407_v20  ;;  %v1409_v33 = vsub.f32 0.0, %v1393_v22  ;;  %v1395_v36 = vadd.f32 %v2845_v54, %v1372_v28 }
 0x156   : > { %2257 = vmatpush3.bf16.msra.mxu0 %v2254_v50  ;;  %2380 = vpow2.f32 %v1419_v24  ;;  %v1373_v38 = vmul.f32 %v2843_v53, %v2780_v27  ;;  %v1429_v39 = vmul.f32 1.442695, %v1408_v32  ;;  %v1374_v41 = vmul.f32 %v2843_v53, %v2786_v37  ;;  %v1499_v28 = vld [vmem:[%s3027_s8] sm:$0x1] }
 0x157   : > { %2259 = vmatprep.subr.bf16.mxu0 %v2258_v60  ;;  %2382 = vpow2.f32 %v1421_v25  ;;  %v1431_v40 = vmul.f32 1.442695, %v1409_v33  ;;  %v1410_v42 = vsub.f32 0.0, %v1394_v34  ;;  %v1411_v44 = vsub.f32 0.0, %v1395_v36 }
 0x158   : > { %2384 = vpow2.f32 %v1423_v26  ;;  %v1396_v46 = vadd.f32 %v2845_v54, %v1373_v38  ;;  %v1397_v49 = vadd.f32 %v2845_v54, %v1374_v41  ;;  %v1375_v50 = vmul.f32 %v2843_v53, %v2784_v35 }
 0x159   : > { %2386 = vpow2.f32 %v1425_v30  ;;  %v1376_v55 = vmul.f32 %v2843_v53, %v2790_v45  ;;  %v1433_v56 = vmul.f32 1.442695, %v1410_v42  ;;  %v1435_v57 = vmul.f32 1.442695, %v1411_v44 }
 0x15a   : > { %2261 = vmatpush3.bf16.msra.mxu0 %v2258_v60  ;;  %2388 = vpow2.f32 %v1427_v31  ;;  %v1412_v58 = vsub.f32 0.0, %v1396_v46  ;;  %v1413_v59 = vsub.f32 0.0, %v1397_v49  ;;  %v1398_v60 = vadd.f32 %v2845_v54, %v1375_v50 }
 0x15b   : > { %2263 = vmatprep.subr.bf16.mxu0 %v2262_v61  ;;  %2390 = vpow2.f32 %v1429_v39  ;;  %v1399_v62 = vadd.f32 %v2845_v54, %v1376_v55  ;;  %v2270_v63 = vpack.c.bf16 %v1574_v48, %v1573_v47  ;;  %v1502_v0 = vlaneseq }
 0x15c   : > { %2392 = vpow2.f32 %v1431_v40  ;;  %v1437_v3 = vmul.f32 1.442695, %v1412_v58  ;;  %v1439_v4 = vmul.f32 1.442695, %v1413_v59  ;;  %v1414_v5 = vsub.f32 0.0, %v1398_v60 }
 0x15d   : > { %2394 = vpow2.f32 %v1433_v56  ;;  %v1415_v9 = vsub.f32 0.0, %v1399_v62  ;;  %v1503_v16 = vshrl.u32 %v1502_v0, 7  ;;  %v1377_v17 = vmul.f32 %v2843_v53, %v2788_v43 }
 0x15e   : > { %2265 = vmatpush3.bf16.msra.mxu0 %v2262_v61  ;;  %2396 = vpow2.f32 %v1435_v57  ;;  %v1441_v61 = vmul.f32 1.442695, %v1414_v5  ;;  %v2274_v20 = vpack.c.bf16 %v1576_v11, %v1575_v10  ;;  %v1378_v23 = vmul.f32 %v2843_v53, %v2794_v52 }
 0x15f   : > { %2267 = vmatprep.subr.bf16.mxu0 %v2868_v6  ;;  %2398 = vpow2.f32 %v1437_v3  ;;  %v1443_v12 = vmul.f32 1.442695, %v1415_v9  ;;  %v1379_v26 = vmul.f32 %v2843_v53, %v2792_v51  ;;  %v1400_v33 = vadd.f32 %v2845_v54, %v1377_v17 }
 0x160   : > { %v2381_v15 = vpop.eup %2380  ;;  %2400 = vpow2.f32 %v1439_v4  ;;  %v2918_v36 = vsub.s32 0, %v1503_v16  ;;  %v1401_v53 = vadd.f32 %v2845_v54, %v1378_v23  ;;  %v1500_v40 = vsub.f32 1.0, %v1499_v28 }
 0x161   : > { %v2383_v18 = vpop.eup %2382  ;;  %v1451_v22 = vadd.f32 1.0, %v2381_v15  ;;  %2402 = vpow2.f32 %v1441_v61  ;;  %v1402_v42 = vadd.f32 %v2845_v54, %v1379_v26  ;;  %v1416_v49 = vsub.f32 0.0, %v1400_v33 }
 0x162   : > { %2269 = vmatpush3.bf16.msra.mxu0 %v2868_v6  ;;  %v2385_v24 = vpop.eup %2384  ;;  %v1452_v25 = vadd.f32 1.0, %v2383_v18  ;;  %2404 = vpow2.f32 %v1443_v12  ;;  %v1417_v56 = vsub.f32 0.0, %v1401_v53  ;;  %v2923_v58 = vrot.slane %v1500_v40, %v2918_v36 }
 0x163   : > { %2271 = vmatprep.subr.bf16.mxu0 %v2270_v63  ;;  %v2387_v6 = vpop.eup %2386  ;;  %2406 = vrcp.f32 %v1451_v22  ;;  %v1453_v30 = vadd.f32 1.0, %v2385_v24  ;;  %v1418_v60 = vsub.f32 0.0, %v1402_v42  ;;  %v2926_v0 = vrot.slane %v1499_v28, %v2918_v36 }
 0x164   : > { %v2389_v31 = vpop.eup %2388  ;;  %2408 = vrcp.f32 %v1452_v25  ;;  %v1454_v32 = vadd.f32 1.0, %v2387_v6  ;;  %v1445_v4 = vmul.f32 1.442695, %v1416_v49  ;;  %v1447_v10 = vmul.f32 1.442695, %v1417_v56 }
 0x165   : > { %v2391_v34 = vpop.eup %2390  ;;  %2410 = vrcp.f32 %v1453_v30  ;;  %v1455_v38 = vadd.f32 1.0, %v2389_v31  ;;  %v1449_v12 = vmul.f32 1.442695, %v1418_v60 }
 0x166   : > { %2273 = vmatpush3.bf16.msra.mxu0 %v2270_v63  ;;  %v2393_v39 = vpop.eup %2392  ;;  %2412 = vrcp.f32 %v1454_v32  ;;  %v1456_v41 = vadd.f32 1.0, %v2391_v34 }
 0x167   : > { %2275 = vmatprep.subr.bf16.mxu0 %v2274_v20  ;;  %v2395_v44 = vpop.eup %2394  ;;  %2414 = vrcp.f32 %v1455_v38  ;;  %v1457_v46 = vadd.f32 1.0, %v2393_v39 }
 0x168   : > { %v2397_v47 = vpop.eup %2396  ;;  %2416 = vrcp.f32 %v1456_v41  ;;  %v1458_v48 = vadd.f32 1.0, %v2395_v44 }
 0x169   : > { %v2399_v50 = vpop.eup %2398  ;;  %2418 = vrcp.f32 %v1457_v46  ;;  %v1459_v55 = vadd.f32 1.0, %v2397_v47 }
 0x16a   : > { %2277 = vmatpush3.bf16.msra.mxu0 %v2274_v20  ;;  %v2401_v57 = vpop.eup %2400  ;;  %2420 = vrcp.f32 %v1458_v48  ;;  %v1460_v59 = vadd.f32 1.0, %v2399_v50 }
 0x16b   : > { %v2403_v54 = vpop.eup %2402  ;;  %2422 = vrcp.f32 %v1459_v55  ;;  %v1461_v62 = vadd.f32 1.0, %v2401_v57 }
 0x16c   : > { %v2405_v63 = vpop.eup %2404  ;;  %2424 = vrcp.f32 %v1460_v59  ;;  %v1462_v3 = vadd.f32 1.0, %v2403_v54 }
 0x16d   : > { %v2407_v5 = vpop.eup %2406  ;;  %2426 = vrcp.f32 %v1461_v62  ;;  %v1463_v9 = vadd.f32 1.0, %v2405_v63 }
 0x16e   : > { %v2409_v11 = vpop.eup %2408  ;;  %v1507_v61 = vmul.f32 %v2407_v5, %v2923_v58  ;;  %2428 = vrcp.f32 %v1462_v3 }
 0x16f   : > { %v2411_v15 = vpop.eup %2410  ;;  %v1508_v16 = vmul.f32 %v2409_v11, %v2923_v58  ;;  %2430 = vrcp.f32 %v1463_v9 }
 0x170   : > { %v2413_v17 = vpop.eup %2412  ;;  %v1529_v18 = vadd.f32 %v2926_v0, %v1507_v61  ;;  %v1509_v20 = vmul.f32 %v2411_v15, %v2923_v58  ;;  %2432 = vpow2.f32 %v1445_v4 }
 0x171   : > { %v2415_v22 = vpop.eup %2414  ;;  %v1530_v23 = vadd.f32 %v2926_v0, %v1508_v16  ;;  %v1510_v24 = vmul.f32 %v2413_v17, %v2923_v58  ;;  %2434 = vpow2.f32 %v1447_v10 }
 0x172   : > { %v2417_v25 = vpop.eup %2416  ;;  %v1545_v26 = vmul.f32 %v1529_v18, %v2766_v2  ;;  %v1531_v6 = vadd.f32 %v2926_v0, %v1509_v20  ;;  %v1511_v28 = vmul.f32 %v2415_v22, %v2923_v58  ;;  %2436 = vpow2.f32 %v1449_v12 }
 0x173   : > { %v2419_v30 = vpop.eup %2418  ;;  %v1546_v31 = vmul.f32 %v1530_v23, %v2764_v1  ;;  %v1532_v32 = vadd.f32 %v2926_v0, %v1510_v24  ;;  %v1512_v33 = vmul.f32 %v2417_v25, %v2923_v58 }
 0x174   : > { %v2421_v34 = vpop.eup %2420  ;;  %2187 = vmatprep.mubr.f32.mxu0 %v1545_v26  ;;  %v1547_v38 = vmul.f32 %v1531_v6, %v2770_v8  ;;  %v1533_v53 = vadd.f32 %v2926_v0, %v1511_v28  ;;  %v1513_v2 = vmul.f32 %v2419_v30, %v2923_v58  ;;  %v2499_v26 = vmov 0.0|0.0   ;;  %v1730_v28 = vld [vmem:[#allocation6] sm:$0x1] }
 0x175   : > { %v2423_v39 = vpop.eup %2422  ;;  %2188 = vmatmul.mubr.f32.vlgmr.msra.gmra.mrb[0].mxu0 %v1546_v31  ;;  %v1548_v40 = vmul.f32 %v1532_v32, %v2768_v7  ;;  %v1534_v41 = vadd.f32 %v2926_v0, %v1512_v33  ;;  %v1514_v1 = vmul.f32 %v2421_v34, %v2923_v58  ;;  %2278 = vmatprep.subr.bf16.mxu1 %v2499_v26  ;;  %v2501_v6 = vmov 0.0  }
 0x176   : > { %v2425_v42 = vpop.eup %2424  ;;  %2190 = vmatprep.mubr.f32.mxu0 %v1547_v38  ;;  %v1549_v44 = vmul.f32 %v1533_v53, %v2774_v14  ;;  %v1535_v46 = vadd.f32 %v2926_v0, %v1513_v2  ;;  %v1515_v8 = vmul.f32 %v2423_v39, %v2923_v58  ;;  %2243 = vmatprep.mubr.msk.f32.mxu1 %vm2500_vm2, %v2501_v6 }
 0x177   : > { %v2427_v47 = vpop.eup %2426  ;;  %v1536_v49 = vadd.f32 %v2926_v0, %v1514_v1  ;;  %v1550_v7 = vmul.f32 %v1534_v41, %v2772_v13  ;;  %v1516_v55 = vmul.f32 %v2425_v42, %v2923_v58 }
 0x178   : > { %v2429_v48 = vpop.eup %2428  ;;  %v1551_v57 = vmul.f32 %v1535_v46, %v2778_v21  ;;  %v1537_v14 = vadd.f32 %v2926_v0, %v1515_v8  ;;  %v1517_v59 = vmul.f32 %v2427_v47, %v2923_v58 }
 0x179   : > { %v2431_v50 = vpop.eup %2430  ;;  %2191 = vmatmul.mubr.f32.gmra.mrb[2].mxu0 %v1548_v40  ;;  %v1552_v63 = vmul.f32 %v1536_v49, %v2776_v19  ;;  %v1538_v4 = vadd.f32 %v2926_v0, %v1516_v55  ;;  %v1518_v13 = vmul.f32 %v2429_v48, %v2923_v58 }
 0x17a   : > { %v2433_v56 = vpop.eup %2432  ;;  %2193 = vmatprep.mubr.f32.mxu0 %v1549_v44  ;;  %v1553_v21 = vmul.f32 %v1537_v14, %v2782_v29  ;;  %v1539_v9 = vadd.f32 %v2926_v0, %v1517_v59  ;;  %v1519_v10 = vmul.f32 %v2431_v50, %v2923_v58 }
 0x17b   : > { %v2435_v60 = vpop.eup %2434  ;;  %v1464_v54 = vadd.f32 1.0, %v2433_v56  ;;  %v1554_v19 = vmul.f32 %v1538_v4, %v2780_v27  ;;  %v1540_v11 = vadd.f32 %v2926_v0, %v1518_v13 }
 0x17c   : > { %v2437_v62 = vpop.eup %2436  ;;  %v1465_v3 = vadd.f32 1.0, %v2435_v60  ;;  %v1555_v61 = vmul.f32 %v1539_v9, %v2786_v37  ;;  %v1541_v12 = vadd.f32 %v2926_v0, %v1519_v10 }
 0x17d   : > { %2194 = vmatmul.mubr.f32.gmra.mrb[4].mxu0 %v1550_v7  ;;  %2438 = vrcp.f32 %v1464_v54  ;;  %v1466_v5 = vadd.f32 1.0, %v2437_v62  ;;  %v1556_v15 = vmul.f32 %v1540_v11, %v2784_v35 }
 0x17e   : > { %2196 = vmatprep.mubr.f32.mxu0 %v1551_v57  ;;  %2440 = vrcp.f32 %v1465_v3  ;;  %v1557_v29 = vmul.f32 %v1541_v12, %v2790_v45 }
 0x17f   : > { %2442 = vrcp.f32 %v1466_v5 }
 0x181   : > { %2197 = vmatmul.mubr.f32.gmra.mrb[6].mxu0 %v1552_v63 }
 0x182   : > { %2199 = vmatprep.mubr.f32.mxu0 %v1553_v21 }
 0x185   : > { %2200 = vmatmul.mubr.f32.gmra.mrb[8].mxu0 %v1554_v19  ;;  %v1729_v19 = vld [vmem:[%s3030_s11] sm:$0x1] }
 0x186   : > { %2202 = vmatprep.mubr.f32.mxu0 %v1555_v61 }
 0x187   : > { %v2439_v16 = vpop.eup %2438 }
 0x188   : > { %v2441_v17 = vpop.eup %2440  ;;  %v1520_v18 = vmul.f32 %v2439_v16, %v2923_v58 }
 0x189   : > { %v2443_v20 = vpop.eup %2442  ;;  %2203 = vmatmul.mubr.f32.gmra.mrb[10].mxu0 %v1556_v15  ;;  %v1521_v27 = vmul.f32 %v2441_v17, %v2923_v58 }
 0x18a   : > { %2205 = vmatprep.mubr.f32.mxu0 %v1557_v29  ;;  %v1542_v22 = vadd.f32 %v2926_v0, %v1520_v18  ;;  %v1522_v37 = vmul.f32 %v2443_v20, %v2923_v58  ;;  %v2502_v58 = vmov 0  }
 0x18b   : > { %v1543_v23 = vadd.f32 %v2926_v0, %v1521_v27  ;;  %2379 = vset.pattern.permute.xlu0 %v2502_v58 }
 0x18c   : > { %v1558_v35 = vmul.f32 %v1542_v22, %v2788_v43  ;;  %v1544_v24 = vadd.f32 %v2926_v0, %v1522_v37  ;;  %1733 = vperm.xlu0 %2379, %v1730_v28   ;;  %v1970_v43 = vld [vmem:[%s3029_s10] ss:$0 sm:$0xff] }
 0x18d   : > { %v1559_v45 = vmul.f32 %v1543_v23, %v2794_v52 }
 0x18e   : > { %2206 = vmatmul.mubr.f32.gmra.mrb[12].mxu0 %v1558_v35  ;;  %v1560_v25 = vmul.f32 %v1544_v24, %v2792_v51 }
 0x18f   : > { %2208 = vmatprep.mubr.f32.mxu0 %v1559_v45 }
 0x192   : > { %2209 = vmatmul.mubr.f32.gmra.mrb[14].mxu0 %v1560_v25 }
 0x20b   : > { %v1734_v11 = vpop.permute.xlu0 %1733 }
 0x20c   : > { %v1739_v61 = vrot.slane %v1734_v11, %v2918_v36 }
 0x248   : > { %v2189_v0 = vpop.f32.mrb[0].mxu0 }
 0x249   : > { %v1656_v52 = vadd.f32 %v2189_v0, %v1970_v43  ;;  %v1650_v30 = vpop.f32.mrb[1].mxu0 }
 0x24a   : > { %v1651_v31 = vadd.f32 %v1970_v43, %v1650_v30 }
 0x24c   : > { %v2279_v51 = vpack.c.bf16 %v1656_v52, %v1651_v31  ;;  %v2192_v32 = vpop.f32.mrb[2].mxu0 }
 0x24d   : > { %v1666_v33 = vadd.f32 %v2192_v32, %v1970_v43  ;;  %v1660_v34 = vpop.f32.mrb[3].mxu0 }
 0x24e   : > { %2280 = vmatpush3.bf16.xpose.msra.mxu1 %v2279_v51  ;;  %v1661_v38 = vadd.f32 %v1970_v43, %v1660_v34 }
 0x24f   : > { %2281 = vmatprep.subr.bf16.mxu1 %v2499_v26 }
 0x250   : > { %v2282_v53 = vpack.c.bf16 %v1666_v33, %v1661_v38  ;;  %v2195_v2 = vpop.f32.mrb[4].mxu0 }
 0x251   : > { %v1676_v39 = vadd.f32 %v2195_v2, %v1970_v43  ;;  %v1670_v40 = vpop.f32.mrb[5].mxu0 }
 0x252   : > { %v1671_v41 = vadd.f32 %v1970_v43, %v1670_v40 }
 0x254   : > { %v2285_v1 = vpack.c.bf16 %v1676_v39, %v1671_v41  ;;  %v2198_v42 = vpop.f32.mrb[6].mxu0 }
 0x255   : > { %v1686_v44 = vadd.f32 %v2198_v42, %v1970_v43  ;;  %v1680_v46 = vpop.f32.mrb[7].mxu0 }
 0x256   : > { %2283 = vmatpush3.bf16.xpose.msra.mxu1 %v2282_v53  ;;  %v1681_v8 = vadd.f32 %v1970_v43, %v1680_v46 }
 0x257   : > { %2284 = vmatprep.subr.bf16.mxu1 %v2499_v26 }
 0x258   : > { %v2288_v47 = vpack.c.bf16 %v1686_v44, %v1681_v8  ;;  %v2201_v48 = vpop.f32.mrb[8].mxu0 }
 0x259   : > { %v1696_v49 = vadd.f32 %v2201_v48, %v1970_v43  ;;  %v1690_v50 = vpop.f32.mrb[9].mxu0 }
 0x25a   : > { %v1691_v7 = vadd.f32 %v1970_v43, %v1690_v50 }
 0x25c   : > { %v2291_v55 = vpack.c.bf16 %v1696_v49, %v1691_v7  ;;  %v2204_v56 = vpop.f32.mrb[10].mxu0 }
 0x25d   : > { %v1706_v57 = vadd.f32 %v2204_v56, %v1970_v43  ;;  %v1700_v14 = vpop.f32.mrb[11].mxu0 }
 0x25e   : > { %2286 = vmatpush3.bf16.xpose.msra.mxu1 %v2285_v1  ;;  %v1701_v59 = vadd.f32 %v1970_v43, %v1700_v14 }
 0x25f   : > { %2287 = vmatprep.subr.bf16.mxu1 %v2499_v26 }
 0x260   : > { %v2294_v60 = vpack.c.bf16 %v1706_v57, %v1701_v59 }
 0x261   : > { %v2207_v54 = vpop.f32.mrb[12].mxu0 }
 0x262   : > { %v1716_v62 = vadd.f32 %v2207_v54, %v1970_v43  ;;  %v1710_v63 = vpop.f32.mrb[13].mxu0 }
 0x263   : > { %v1711_v3 = vadd.f32 %v1970_v43, %v1710_v63 }
 0x265   : > { %v2297_v4 = vpack.c.bf16 %v1716_v62, %v1711_v3  ;;  %v2210_v13 = vpop.f32.mrb[14].mxu0 }
 0x266   : > { %2289 = vmatpush3.bf16.xpose.msra.mxu1 %v2288_v47  ;;  %v1726_v5 = vadd.f32 %v2210_v13, %v1970_v43  ;;  %v1720_v21 = vpop.f32.mrb[15].mxu0 }
 0x267   : > { %2290 = vmatprep.subr.bf16.mxu1 %v2499_v26  ;;  %v1721_v9 = vadd.f32 %v1970_v43, %v1720_v21 }
 0x269   : > { %v2300_v10 = vpack.c.bf16 %v1726_v5, %v1721_v9 }
 0x26e   : > { %2292 = vmatpush3.bf16.xpose.msra.mxu1 %v2291_v55 }
 0x26f   : > { %2293 = vmatprep.subr.bf16.mxu1 %v2499_v26 }
 0x276   : > { %2295 = vmatpush3.bf16.xpose.msra.mxu1 %v2294_v60 }
 0x277   : > { %2296 = vmatprep.subr.bf16.mxu1 %v2499_v26 }
 0x27e   : > { %2298 = vmatpush3.bf16.xpose.msra.mxu1 %v2297_v4 }
 0x27f   : > { %2299 = vmatprep.subr.bf16.mxu1 %v2499_v26 }
 0x286   : > { %2301 = vmatpush3.bf16.xpose.msra.mxu1 %v2300_v10 }
 0x28d   : > { %2244 = vmatmul.mubr.f32.vlgmr.msra.gmra.mrb[0].mxu1 %v1729_v19 }
 0x360   : > { %v1806_v12 = vpop.f32.mrb[0].mxu1 }
 0x361   : > { %v1807_v15 = vadd.f32 %v1806_v12, %v1739_v61  ;;  %v2245_v29 = vpop.f32.mrb[1].mxu1 }
 0x363   : > { %1810 = vst [vmem:[#allocation7] sm:$0x1] %v1807_v15 }
 0x364 PF: > { %p2985_p8 = scmp.eq.s32.totalorder %s1906_s12, 1  ;;  %s2503_s19 = smov [#allocation7]  }
 0x365   : > { %s1825_s20 = sshll.u32 %s2503_s19, 4  ;;  %s1826_s20 = int_to_ptr.vmem [resolvable:$true] %s1825_s20 }
 0x366   : > { %s2444_s21 = scalar_lea.vmem %s1826_s20, 16  ;;  %s2450_s22 = scalar_lea.vmem %s1826_s20, 32 }
 0x367   : > { %p2445_p9 = scmp.ne.s32.totalorder %s1826_s20, %s2444_s21  ;;  %p2451_p12 = scmp.lt.s32.totalorder %s1826_s20, %s1826_s20 }
 0x368   : > { %p2452_p13 = scmp.lt.s32.totalorder %s2450_s22, %s2444_s21 }
 0x369   : > { %p2446_p10 = pnand %p2445_p9, %p2985_p8 }
 0x36a   : > { %p2453_p0 = por %p2452_p13, %p2451_p12 }
 0x36b   : > { %p2447_p11 = pneg %p2446_p10 }
 0x36d   : > { %p2454_p1 = pnand %p2453_p0, %p2447_p11 }
 0x36f   : > { %2457 = shalt.err (!%p2454_p1)
}
 0x370   : > { %s2458_s24 = scalar_lea.hbm %s3032_s13, 16 }
 0x371   : > { %p2459_p2 = scmp.ne.s32.totalorder %s3032_s13, %s2458_s24  ;;  %p2464_p5 = scmp.lt.u32.totalorder %s2458_s24, %s3032_s13 }
 0x373   : > { %p2460_p3 = pnand %p2459_p2, %p2985_p8 }
 0x375   : > { %p2461_p4 = pneg %p2460_p3 }
 0x377   : > { %p2466_p6 = pnand %p2464_p5, %p2461_p4 }
 0x379   : > { %2469 = shalt.err (!%p2466_p6)
}
 0x37a   : > { %2337 = dma.vmem_to_hbm [thread:$0]  (%p2985_p8), %s1826_s20, 16, %s3032_s13, [#allocation8]  }
 0x37b PF: > { %p2345_p7 = scmp.ge.s32.totalorder %s2496_s29, 2  ;;  %p2346_p9 = scmp.eq.s32.totalorder %s1907_s30, 1 }
 0x37d   : > { %p2341_p10 = pnand %p2346_p9, %p2345_p7 }
 0x37f   : > { %2483 = dma.done.wait (!%p2341_p10), [#allocation8], 16  }
 0x380   : > { %2485 = vsyncadd (!%p2341_p10), [#allocation8], 4294967280  ;;  %s28_s29 = sadd.s32 1, %s2496_s29   ;;  %s3034_s27 = smov %s2492_s28 }
 0x381   : > { %p25_p11 = scmp.ge.s32.totalorder %s28_s29, 4   ;;  %s3035_s28 = smov %s3037_s14 }
 0x383   :  { %27 = sbr.rel (!%p25_p11) target bundleno = 6 (0x6), region = 126 }
 0x38a   :  { %1842 = vsyncpa [#allocation8], 1 }
 0x38b   :  { %1844 = vsyncpa [#allocation8 + $0x1], 1 }

</bundles_post_ra>
